<compile_context>
chip_gen: v5e
topology: v5e:2x2
jax: 0.10.0
libtpu: 0.0.40
codegen_flags: <defaults>
</compile_context>

<pallas_src>
import functools

import jax
import jax.numpy as jnp
from jax.experimental import pallas as pl
from jax.experimental.pallas import tpu as pltpu


def _round_up(x, m):
    return ((x + m - 1) // m) * m


# ------------------------------ Pallas kernel --------------------------------

def sil_fused_kernel(cols_ref, wc_ref, bc_ref, wfc_ref, bfc_ref, o_ref):
    """Fused conv(as one im2col matmul) + bias + ReLU + GAP + Linear + sigmoid.

    Bt images per grid step (grid = (B_pad // Bt,), "parallel").

      cols_ref : (Bt, HW, Kp)   bf16  im2col operand (Kp = 9*C padded to 128)
      wc_ref   : (Kp, C1p)      bf16  conv weight slab (zero-padded K rows)
      bc_ref   : (1, C1p)       f32   conv bias (zero-padded lanes)
      wfc_ref  : (C1p, NCp)     bf16  classifier weight (zero-padded)
      bfc_ref  : (1, NCp)       f32   classifier bias (zero-padded lanes)
      o_ref    : (1, Bt, NCp)   f32   sigmoid scores (lane-dense)
    """
    Bt, HW, Kp = cols_ref.shape
    C1p = wc_ref.shape[1]

    # Single lane-dense MXU matmul replaces the 9-tap accumulate loop.
    cols = cols_ref[...].reshape(Bt * HW, Kp)                     # bf16
    acc = jnp.dot(cols, wc_ref[...],
                  preferred_element_type=jnp.float32)             # (Bt*HW, C1p) f32

    # Bias + ReLU in f32; zero-padded channels stay exactly 0 through ReLU/GAP.
    feat = jnp.maximum(acc + bc_ref[...], 0.0)                    # (Bt*HW, C1p)

    # Global average pool over space, per image.
    gap = feat.reshape(Bt, HW, C1p).sum(axis=1) * (1.0 / HW)      # (Bt, C1p) f32

    # Linear head (bf16 MXU, f32 accumulate) + sigmoid (SIL 'sigmoid').
    logits = jnp.dot(gap.astype(jnp.bfloat16), wfc_ref[...],
                     preferred_element_type=jnp.float32) + bfc_ref[...]
    o_ref[...] = jax.nn.sigmoid(logits).reshape(o_ref.shape)


# ------------------------------ pallas_call wrapper ---------------------------

def _choose_bt(B, HW, Kp, C1p):
    """Images per grid step: amortize step overhead, keep >=2 blocks for v7x
    megacore when B > 1, and budget activations against 32 MiB scoped VMEM."""
    bt = B if B <= 1 else -(-B // 2)            # ceil(B/2): >= 2 grid blocks
    bt = max(1, min(bt, 16))

    def step_bytes(b):
        # acc + feat (f32) + double-buffered im2col input (bf16).
        return 2 * b * HW * C1p * 4 + 2 * b * HW * Kp * 2

    while bt > 1 and step_bytes(bt) > 8 * 1024 * 1024:
        bt = (bt + 1) // 2
    return bt


def sil_forward_fused(cols, w_conv, b_conv, w_fc, b_fc, bt):
    """cols: (B_pad, HW, Kp) bf16 with B_pad % bt == 0. Returns (B_pad, NCp) f32."""
    Bp, HW, Kp = cols.shape
    C1p = w_conv.shape[1]
    NCp = w_fc.shape[1]
    G = Bp // bt
    out = pl.pallas_call(
        sil_fused_kernel,
        out_shape=jax.ShapeDtypeStruct((G, bt, NCp), jnp.float32),
        grid=(G,),
        in_specs=[
            # Bt images per step; last two block dims (HW, Kp) are the full
            # array extents (sublane/lane-dense at these shapes).
            pl.BlockSpec((bt, HW, Kp), lambda g: (g, 0, 0)),
            # Constant index_maps: weights/biases stay resident in VMEM across
            # grid steps (block index never changes -> no per-step re-DMA).
            pl.BlockSpec((Kp, C1p), lambda g: (0, 0)),
            pl.BlockSpec((1, C1p), lambda g: (0, 0)),
            pl.BlockSpec((C1p, NCp), lambda g: (0, 0)),
            pl.BlockSpec((1, NCp), lambda g: (0, 0)),
        ],
        # (1, Bt, NCp): last two dims equal the full array extents -> dense store.
        out_specs=pl.BlockSpec((1, bt, NCp), lambda g: (g, 0, 0)),
        compiler_params=pltpu.CompilerParams(
            dimension_semantics=("parallel",),   # megacore shards the batch (v7x)
            vmem_limit_bytes=32 * 1024 * 1024,
        ),
    )(cols, w_conv, b_conv, w_fc, b_fc)
    return out.reshape(Bp, NCp)


# --------------------------------- SIL model ----------------------------------

class SILmodelPallas:
    """SIL (single-instance-learning) model: per-image score, flattened per batch."""

    def __init__(self, config_params, key):
        self.channel = config_params['channel']            # input channels ('inchans')
        self.num_classes = config_params['numclasses']
        self.c1 = config_params['stem_channels']           # conv-stem output channels
        C, C1, NC = self.channel, self.c1, self.num_classes
        self.kp = _round_up(9 * C, 128)                    # lane-dense im2col depth
        self.c1p = _round_up(C1, 128)                      # lane-dense feature width
        self.ncp = _round_up(NC, 128)                      # lane-dense output width
        k1, k2, k3, k4 = jax.random.split(key, 4)

        # PyTorch-layout conv weight (C_out, C_in, 3, 3) -> single im2col-matmul
        # slab (Kp, C1p):  row index t*C + c, t = dh*3 + dw (matches the
        # wrapper-side im2col column order), zero-padded K rows / output lanes.
        w_conv = jax.random.normal(k1, (C1, C, 3, 3), jnp.float32) * 0.1
        w_mat = jnp.transpose(w_conv, (2, 3, 1, 0)).reshape(9 * C, C1)
        self.w_conv = (jnp.zeros((self.kp, self.c1p), jnp.float32)
                       .at[:9 * C, :C1].set(w_mat).astype(jnp.bfloat16))
        b_conv = jax.random.normal(k2, (C1,), jnp.float32) * 0.01
        self.b_conv = jnp.zeros((1, self.c1p), jnp.float32).at[0, :C1].set(b_conv)

        # PyTorch-layout Linear head (NC, C1) -> (C1p, NCp) matmul form, bf16.
        w_fc = jax.random.normal(k3, (NC, C1), jnp.float32) * 0.1
        self.w_fc = (jnp.zeros((self.c1p, self.ncp), jnp.float32)
                     .at[:C1, :NC].set(w_fc.T).astype(jnp.bfloat16))
        b_fc = jax.random.normal(k4, (NC,), jnp.float32) * 0.01
        self.b_fc = jnp.zeros((1, self.ncp), jnp.float32).at[0, :NC].set(b_fc)

    @functools.partial(jax.jit, static_argnums=(0, 2))
    def forward(self, x, eval_mode=True):
        # x: NCHW (B, C, H, W), like PyTorch.
        B, C, H, W = x.shape
        HW = H * W

        # NCHW -> NHWC, 'same' zero pad, wrapper-side im2col (lane-dense Kp).
        xn = jnp.transpose(x, (0, 2, 3, 1))
        xp = jnp.pad(xn, ((0, 0), (1, 1), (1, 1), (0, 0)))
        taps = [xp[:, dh:dh + H, dw:dw + W, :]
                for dh in range(3) for dw in range(3)]            # t = dh*3 + dw
        cols = jnp.concatenate(taps, axis=-1).reshape(B, HW, 9 * C)
        cols = jnp.pad(cols, ((0, 0), (0, 0), (0, self.kp - 9 * C)))
        cols = cols.astype(jnp.bfloat16)                          # bf16 MXU input

        # Batch images per grid step; pad batch to a multiple of Bt.
        bt = _choose_bt(B, HW, self.kp, self.c1p)
        b_pad = _round_up(B, bt)
        if b_pad != B:
            cols = jnp.pad(cols, ((0, b_pad - B), (0, 0), (0, 0)))

        scores = sil_forward_fused(cols, self.w_conv, self.b_conv,
                                   self.w_fc, self.b_fc, bt)      # (B_pad, NCp)
        M = scores[:B, :self.num_classes]                         # drop padding
        M = M.reshape(M.shape[0], -1)                             # M.view(M.shape[0], -1)
        return M


# ------------------------------------ main ------------------------------------

if __name__ == "__main__":
    config_params = {
        'activation': 'sigmoid',
        'femodel': 'resnet18',
        'extra': None,
        'topkpatch': None,
        'pretrained': False,
        'channel': 4,
        'regionpooling': 'avgpool',
        'learningtype': 'SIL',
        'numclasses': 1,
        'stem_channels': 32,
    }

    key = jax.random.PRNGKey(0)
    k_model, k_x = jax.random.split(key)
    model = SILmodelPallas(config_params, k_model)

    # NCHW input, consistent with the PyTorch module.
    x = jax.random.normal(k_x, (2, config_params['channel'], 16, 16), jnp.float32)

    M = model.forward(x, eval_mode=True)
    M = jax.block_until_ready(M)
    # (PyTorch forward prints M.shape; omitted here to keep stdout clean.)
    assert M.shape == (2, config_params['numclasses'])
    assert bool(jnp.all(jnp.isfinite(M)))
    assert bool(jnp.all((M >= 0.0) & (M <= 1.0)))   # sigmoid range
    print("KERNEL_OK")
</pallas_src>

<mosaic_0001>
module attributes {stable_mosaic.version = 11 : i64} {
  func.func @sil_fused_kernel(%arg0: i32, %arg1: memref<1x256x128xbf16, #tpu.memory_space<vmem>>, %arg2: memref<128x128xbf16, #tpu.memory_space<vmem>>, %arg3: memref<1x128xf32, #tpu.memory_space<vmem>>, %arg4: memref<128x128xbf16, #tpu.memory_space<vmem>>, %arg5: memref<1x128xf32, #tpu.memory_space<vmem>>, %arg6: memref<1x1x128xf32, #tpu.memory_space<vmem>>) attributes {dimension_semantics = [#tpu.dimension_semantics<parallel>], iteration_bounds = array<i64: 2>, scalar_prefetch = 0 : i64, scratch_operands = 0 : i64, tpu.core_type = #tpu.core_type<tc>, window_params = [{transform_indices = @transform_0, window_bounds = array<i64: 1, 256, 128>}, {pipeline_mode = #tpu.pipeline_mode<synchronous>, transform_indices = @transform_1, window_bounds = array<i64: 128, 128>}, {pipeline_mode = #tpu.pipeline_mode<synchronous>, transform_indices = @transform_2, window_bounds = array<i64: 1, 128>}, {pipeline_mode = #tpu.pipeline_mode<synchronous>, transform_indices = @transform_3, window_bounds = array<i64: 128, 128>}, {pipeline_mode = #tpu.pipeline_mode<synchronous>, transform_indices = @transform_4, window_bounds = array<i64: 1, 128>}, {transform_indices = @transform_5, window_bounds = array<i64: 1, 1, 128>}]} {
    %c0 = arith.constant 0 : index
    %c0_0 = arith.constant 0 : index
    %c0_1 = arith.constant 0 : index
    %0 = vector.load %arg1[%c0, %c0_0, %c0_1] : memref<1x256x128xbf16, #tpu.memory_space<vmem>>, vector<1x256x128xbf16>
    %1 = vector.shape_cast %0 : vector<1x256x128xbf16> to vector<256x128xbf16>
    %c0_2 = arith.constant 0 : index
    %c0_3 = arith.constant 0 : index
    %2 = vector.load %arg2[%c0_2, %c0_3] : memref<128x128xbf16, #tpu.memory_space<vmem>>, vector<128x128xbf16>
    %cst = arith.constant dense<0.000000e+00> : vector<256x128xf32>
    %3 = tpu.matmul %1, %2, %cst {dimension_numbers = #tpu.dot_dimension_numbers<[1], [0], [0], [1], [0, 0, 1, 1], [], []>} : vector<256x128xbf16>, vector<128x128xbf16>, vector<256x128xf32> -> vector<256x128xf32>
    %c0_4 = arith.constant 0 : index
    %c0_5 = arith.constant 0 : index
    %4 = vector.load %arg3[%c0_4, %c0_5] : memref<1x128xf32, #tpu.memory_space<vmem>>, vector<1x128xf32>
    %5 = vector.broadcast %4 : vector<1x128xf32> to vector<256x128xf32>
    %6 = arith.addf %3, %5 : vector<256x128xf32>
    %cst_6 = arith.constant 0.000000e+00 : f32
    %7 = vector.broadcast %cst_6 : f32 to vector<256x128xf32>
    %8 = arith.maximumf %6, %7 : vector<256x128xf32>
    %9 = vector.shape_cast %8 : vector<256x128xf32> to vector<1x256x128xf32>
    %cst_7 = arith.constant dense<0.000000e+00> : vector<1x128xf32>
    %10 = vector.multi_reduction <add>, %9, %cst_7 [1] : vector<1x256x128xf32> to vector<1x128xf32>
    %cst_8 = arith.constant 3.906250e-03 : f32
    %11 = vector.broadcast %cst_8 : f32 to vector<1x128xf32>
    %12 = arith.mulf %10, %11 : vector<1x128xf32>
    %13 = arith.truncf %12 : vector<1x128xf32> to vector<1x128xbf16>
    %c0_9 = arith.constant 0 : index
    %c0_10 = arith.constant 0 : index
    %14 = vector.load %arg4[%c0_9, %c0_10] : memref<128x128xbf16, #tpu.memory_space<vmem>>, vector<128x128xbf16>
    %cst_11 = arith.constant dense<0.000000e+00> : vector<1x128xf32>
    %15 = tpu.matmul %13, %14, %cst_11 {dimension_numbers = #tpu.dot_dimension_numbers<[1], [0], [0], [1], [0, 0, 1, 1], [], []>} : vector<1x128xbf16>, vector<128x128xbf16>, vector<1x128xf32> -> vector<1x128xf32>
    %c0_12 = arith.constant 0 : index
    %c0_13 = arith.constant 0 : index
    %16 = vector.load %arg5[%c0_12, %c0_13] : memref<1x128xf32, #tpu.memory_space<vmem>>, vector<1x128xf32>
    %17 = arith.addf %15, %16 : vector<1x128xf32>
    %18 = arith.negf %17 : vector<1x128xf32>
    %19 = math.exp %18 : vector<1x128xf32>
    %cst_14 = arith.constant 1.000000e+00 : f32
    %20 = vector.broadcast %cst_14 : f32 to vector<1x128xf32>
    %21 = arith.addf %20, %19 : vector<1x128xf32>
    %22 = arith.divf %20, %21 : vector<1x128xf32>
    %23 = vector.shape_cast %22 : vector<1x128xf32> to vector<1x1x128xf32>
    %c0_15 = arith.constant 0 : index
    %c0_16 = arith.constant 0 : index
    %c0_17 = arith.constant 0 : index
    %24 = vector.load %arg6[%c0_15, %c0_16, %c0_17] : memref<1x1x128xf32, #tpu.memory_space<vmem>>, vector<1x1x128xf32>
    tpu.vector_store %arg6[%c0_15, %c0_16, %c0_17], %23 {strides = array<i32>} : memref<1x1x128xf32, #tpu.memory_space<vmem>>, vector<1x1x128xf32>,
    return
  }
  func.func @transform_0(%arg0: i32) -> (i32, i32, i32) {
    %c0_i32 = arith.constant 0 : i32
    %c0_i32_0 = arith.constant 0 : i32
    %c0_i32_1 = arith.constant 0 : i32
    return %arg0, %c0_i32, %c0_i32_0 : i32, i32, i32
  }
  func.func @transform_1(%arg0: i32) -> (i32, i32) {
    %c0_i32 = arith.constant 0 : i32
    %c0_i32_0 = arith.constant 0 : i32
    %c0_i32_1 = arith.constant 0 : i32
    return %c0_i32, %c0_i32_0 : i32, i32
  }
  func.func @transform_2(%arg0: i32) -> (i32, i32) {
    %c0_i32 = arith.constant 0 : i32
    %c0_i32_0 = arith.constant 0 : i32
    %c0_i32_1 = arith.constant 0 : i32
    return %c0_i32, %c0_i32_0 : i32, i32
  }
  func.func @transform_3(%arg0: i32) -> (i32, i32) {
    %c0_i32 = arith.constant 0 : i32
    %c0_i32_0 = arith.constant 0 : i32
    %c0_i32_1 = arith.constant 0 : i32
    return %c0_i32, %c0_i32_0 : i32, i32
  }
  func.func @transform_4(%arg0: i32) -> (i32, i32) {
    %c0_i32 = arith.constant 0 : i32
    %c0_i32_0 = arith.constant 0 : i32
    %c0_i32_1 = arith.constant 0 : i32
    return %c0_i32, %c0_i32_0 : i32, i32
  }
  func.func @transform_5(%arg0: i32) -> (i32, i32, i32) {
    %c0_i32 = arith.constant 0 : i32
    %c0_i32_0 = arith.constant 0 : i32
    %c0_i32_1 = arith.constant 0 : i32
    return %arg0, %c0_i32, %c0_i32_0 : i32, i32, i32
  }
}

</mosaic_0001>

<bundles_post_ra>
// kernel: forward.1
= control target key start
LH: loop header
LB: loop body
LE: loop exit
PB: predicated region body
PF: predicated region fallthrough
CT: control target
= control target key end

     0   :  { %s968_s18 = smov 0   ;;  %s1123_s0 = inlined_call_operand.vmem [shape: bf16[2,256,128], index: 0, kind: input, shape index: {}]   ;;  %s1124_s1 = inlined_call_operand.vmem [shape: bf16[128,128], index: 1, kind: input, shape index: {}]   ;;  %s1125_s2 = inlined_call_operand.vmem [shape: f32[1,128], index: 2, kind: input, shape index: {}]   ;;  %s1126_s3 = inlined_call_operand.vmem [shape: bf16[128,128], index: 3, kind: input, shape index: {}]   ;;  %s1127_s4 = inlined_call_operand.vmem [shape: f32[1,128], index: 4, kind: input, shape index: {}]   ;;  %s1128_s5 = inlined_call_operand.vmem [shape: f32[2,1,128], index: 5, kind: output, shape index: {}]  }
   0x1 LB: > { %s722_s19 = sadd.s32 4294967295, %s936_s18   ;;  %p726_p0 = scmp.ge.s32.totalorder %s936_s18, 1  ;;  %s936_s18 = sphi %s968_s18, %s15_s18  }
   0x2   : > { %p187_p1 = scmp.lt.s32.totalorder %s936_s18, 3 }
   0x4   : > { %p188_p2 = pnand %p726_p0, %p187_p1 }
   0x5   : > { %p213_p3 = scmp.lt.s32.totalorder (!%p188_p2), %s722_s19, 1 }
   0x6   : > { %191 = sbr.rel (%p188_p2) target bundleno = 452 (0x1c4), region = 40 }
   0xb   : > { %v884_v0 = vld [vmem:[%s1124_s1 + $0x38] sm:$0xff]  ;;  %v883_v1 = vld [vmem:[%s1124_s1 + $0x30] sm:$0xff]  ;;  %v882_v2 = vld [vmem:[%s1124_s1 + $0x28] sm:$0xff]  ;;  %s1130_s19 = smov (!%p213_p3, %s722_s19), 1 }
   0xc   : > { %417 = vmatpush.bf16.msra.mxu0 %v884_v0  ;;  %894 = vmatpush.bf16.msra.mxu2 %v884_v0  ;;  %v881_v3 = vld [vmem:[%s1124_s1 + $0x20] sm:$0xff]  ;;  %v880_v4 = vld [vmem:[%s1124_s1 + $0x18] sm:$0xff]  ;;  %v879_v5 = vld [vmem:[%s1124_s1 + $0x10] sm:$0xff]  ;;  %s860_s9 = sshll.u32 %s1130_s19, 7 }
   0xd   : > { %895 = vmatpush.bf16.msra.mxu3 %v884_v0  ;;  %893 = vmatpush.bf16.msra.mxu1 %v884_v0  ;;  %v878_v6 = vld [vmem:[%s1124_s1 + $0x8] sm:$0xff]  ;;  %v877_v7 = vld [vmem:[%s1124_s1] sm:$0xff]  ;;  %s1010_s14 = scalar_lea.vmem %s1123_s0, %s860_s9 }
   0xe   : > { %v861_v8 = vld [vmem:[%s1010_s14] sm:$0xff]  ;;  %v867_v9 = vld [vmem:[%s1010_s14 + $0x30] sm:$0xff]  ;;  %v872_v10 = vld [vmem:[%s1010_s14 + $0x58] sm:$0xff] }
   0xf   : > { %v865_v11 = vld [vmem:[%s1010_s14 + $0x20] sm:$0xff]  ;;  %v862_v12 = vld [vmem:[%s1010_s14 + $0x8] sm:$0xff]  ;;  %v868_v13 = vld [vmem:[%s1010_s14 + $0x38] sm:$0xff] }
  0x10   : > { %418 = vmatpush.bf16.msra.mxu0 %v883_v1  ;;  %897 = vmatpush.bf16.msra.mxu2 %v883_v1  ;;  %v873_v14 = vld [vmem:[%s1010_s14 + $0x60] sm:$0xff]  ;;  %v866_v15 = vld [vmem:[%s1010_s14 + $0x28] sm:$0xff]  ;;  %v863_v16 = vld [vmem:[%s1010_s14 + $0x10] sm:$0xff] }
  0x11   : > { %898 = vmatpush.bf16.msra.mxu3 %v883_v1  ;;  %896 = vmatpush.bf16.msra.mxu1 %v883_v1  ;;  %v869_v17 = vld [vmem:[%s1010_s14 + $0x40] sm:$0xff]  ;;  %v874_v18 = vld [vmem:[%s1010_s14 + $0x68] sm:$0xff]  ;;  %v864_v19 = vld [vmem:[%s1010_s14 + $0x18] sm:$0xff] }
  0x12   : > { %v870_v20 = vld [vmem:[%s1010_s14 + $0x48] sm:$0xff]  ;;  %v875_v21 = vld [vmem:[%s1010_s14 + $0x70] sm:$0xff]  ;;  %v876_v23 = vld [vmem:[%s1010_s14 + $0x78] sm:$0xff] }
  0x13   : > { %v871_v22 = vld [vmem:[%s1010_s14 + $0x50] sm:$0xff]  ;;  %v1041_v38 = vld [vmem:[%s1125_s2] ss:$0 sm:$0xff]  ;;  %s220_s14 = scalar_lea.vmem %s1128_s5, %s1130_s19 }
  0x14   : > { %419 = vmatpush.bf16.msra.mxu0 %v882_v2  ;;  %900 = vmatpush.bf16.msra.mxu2 %v882_v2 }
  0x15   : > { %901 = vmatpush.bf16.msra.mxu3 %v882_v2  ;;  %899 = vmatpush.bf16.msra.mxu1 %v882_v2 }
  0x18   : > { %420 = vmatpush.bf16.msra.mxu0 %v881_v3  ;;  %903 = vmatpush.bf16.msra.mxu2 %v881_v3 }
  0x19   : > { %904 = vmatpush.bf16.msra.mxu3 %v881_v3  ;;  %902 = vmatpush.bf16.msra.mxu1 %v881_v3 }
  0x1c   : > { %421 = vmatpush.bf16.msra.mxu0 %v880_v4  ;;  %906 = vmatpush.bf16.msra.mxu2 %v880_v4 }
  0x1d   : > { %907 = vmatpush.bf16.msra.mxu3 %v880_v4  ;;  %905 = vmatpush.bf16.msra.mxu1 %v880_v4 }
  0x20   : > { %422 = vmatpush.bf16.msra.mxu0 %v879_v5  ;;  %909 = vmatpush.bf16.msra.mxu2 %v879_v5 }
  0x21   : > { %910 = vmatpush.bf16.msra.mxu3 %v879_v5  ;;  %908 = vmatpush.bf16.msra.mxu1 %v879_v5 }
  0x24   : > { %423 = vmatpush.bf16.msra.mxu0 %v878_v6  ;;  %912 = vmatpush.bf16.msra.mxu2 %v878_v6 }
  0x25   : > { %913 = vmatpush.bf16.msra.mxu3 %v878_v6  ;;  %911 = vmatpush.bf16.msra.mxu1 %v878_v6 }
  0x28   : > { %424 = vmatpush.bf16.msra.mxu0 %v877_v7  ;;  %915 = vmatpush.bf16.msra.mxu2 %v877_v7 }
  0x29   : > { %916 = vmatpush.bf16.msra.mxu3 %v877_v7  ;;  %914 = vmatpush.bf16.msra.mxu1 %v877_v7 }
  0x2b   : > { %425 = vmatmul.bf16.vlgmr.msra.gmra.mxu0 %v861_v8  ;;  %455 = vmatmul.bf16.vlgmr.msra.gmra.mxu2 %v867_v9 }
  0x2c   : > { %480 = vmatmul.bf16.vlgmr.msra.gmra.mxu3 %v872_v10  ;;  %445 = vmatmul.bf16.vlgmr.msra.gmra.mxu1 %v865_v11 }
  0x3b   : > { %430 = vmatmul.bf16.gmra.mxu0 %v862_v12  ;;  %460 = vmatmul.bf16.gmra.mxu2 %v868_v13 }
  0x3c   : > { %485 = vmatmul.bf16.gmra.mxu3 %v873_v14  ;;  %450 = vmatmul.bf16.gmra.mxu1 %v866_v15  ;;  %v892_v14 = vld [vmem:[%s1126_s3 + $0x38] sm:$0xff] }
  0x3d   : > { %642 = vmatpush.bf16.msrb.mxu1 %v892_v14 }
  0x4b   : > { %435 = vmatmul.bf16.gmra.mxu0 %v863_v16  ;;  %465 = vmatmul.bf16.gmra.mxu2 %v869_v17 }
  0x4c   : > { %490 = vmatmul.bf16.gmra.mxu3 %v874_v18 }
  0x5b   : > { %440 = vmatmul.bf16.gmra.mxu0 %v864_v19  ;;  %470 = vmatmul.bf16.gmra.mxu2 %v870_v20 }
  0x5c   : > { %495 = vmatmul.bf16.gmra.mxu3 %v875_v21  ;;  %v891_v21 = vld [vmem:[%s1126_s3 + $0x30] sm:$0xff] }
  0x5d   : > { %643 = vmatpush.bf16.msrb.mxu1 %v891_v21 }
  0x6b   : > { %475 = vmatmul.bf16.gmra.mxu2 %v871_v22 }
  0x6c   : > { %500 = vmatmul.bf16.gmra.mxu3 %v876_v23 }
  0xa8   : > { %v426_v24 = vpop.f32.mrf.mxu0 }
  0xa9   : > { %v446_v33 = vpop.f32.mrf.mxu1  ;;  %v427_v43 = vadd.f32 %v1041_v38, %v426_v24 }
  0xaa   : > { %v447_v2 = vadd.f32 %v1041_v38, %v446_v33 }
  0xab   : > { %v506_v48 = vmax.f32 %v427_v43, 0.0 }
  0xac   : > { %v514_v10 = vmax.f32 %v447_v2, 0.0 }
  0xae   : > { %v456_v25 = vpop.f32.mrf.mxu2 }
  0xaf   : > { %v1028_v27 = vpop.f32.mrf.mxu3  ;;  %v457_v18 = vadd.f32 %v1041_v38, %v456_v25  ;;  %v890_v25 = vld [vmem:[%s1126_s3 + $0x28] sm:$0xff] }
  0xb0   : > { %v428_v26 = vpop.f32.mrf.mxu0  ;;  %644 = vmatpush.bf16.msrb.mxu1 %v890_v25 }
  0xb1   : > { %v448_v39 = vpop.f32.mrf.mxu1  ;;  %v429_v42 = vadd.f32 %v1041_v38, %v428_v26  ;;  %v518_v26 = vmax.f32 %v457_v18, 0.0 }
  0xb2   : > { %v449_v5 = vadd.f32 %v1041_v38, %v448_v39 }
  0xb3   : > { %v507_v45 = vmax.f32 %v429_v42, 0.0 }
  0xb4   : > { %v515_v15 = vmax.f32 %v449_v5, 0.0 }
  0xb5   : > { %v538_v52 = vadd.f32 %v507_v45, %v506_v48 }
  0xb6   : > { %v458_v28 = vpop.f32.mrf.mxu2 }
  0xb7   : > { %v1030_v30 = vpop.f32.mrf.mxu3  ;;  %v459_v22 = vadd.f32 %v1041_v38, %v458_v28 }
  0xb8   : > { %v431_v29 = vpop.f32.mrf.mxu0 }
  0xb9   : > { %v432_v44 = vadd.f32 %v1041_v38, %v431_v29  ;;  %v451_v55 = vpop.f32.mrf.mxu1  ;;  %v519_v39 = vmax.f32 %v459_v22, 0.0 }
  0xba   : > { %v452_v11 = vadd.f32 %v1041_v38, %v451_v55 }
  0xbb   : > { %v508_v49 = vmax.f32 %v432_v44, 0.0 }
  0xbc   : > { %v516_v19 = vmax.f32 %v452_v11, 0.0 }
  0xbd   : > { %v539_v57 = vadd.f32 %v538_v52, %v508_v49 }
  0xbe   : > { %v461_v31 = vpop.f32.mrf.mxu2 }
  0xbf   : > { %v1034_v35 = vpop.f32.mrf.mxu3  ;;  %v462_v29 = vadd.f32 %v1041_v38, %v461_v31  ;;  %v889_v31 = vld [vmem:[%s1126_s3 + $0x20] sm:$0xff] }
  0xc0   : > { %v433_v32 = vpop.f32.mrf.mxu0  ;;  %645 = vmatpush.bf16.msrb.mxu1 %v889_v31 }
  0xc1   : > { %v434_v46 = vadd.f32 %v1041_v38, %v433_v32  ;;  %v453_v8 = vpop.f32.mrf.mxu1  ;;  %v520_v28 = vmax.f32 %v462_v29, 0.0 }
  0xc2   : > { %v454_v17 = vadd.f32 %v1041_v38, %v453_v8  ;;  %v487_v8 = vadd.f32 %v1041_v38, %v1034_v35 }
  0xc3   : > { %v509_v53 = vmax.f32 %v434_v46, 0.0 }
  0xc4   : > { %v517_v23 = vmax.f32 %v454_v17, 0.0 }
  0xc5   : > { %v540_v60 = vadd.f32 %v539_v57, %v509_v53 }
  0xc6   : > { %v1032_v34 = vpop.f32.mrf.mxu2 }
  0xc7   : > { %v1043_v41 = vpop.f32.mrf.mxu3 }
  0xc8   : > { %v436_v36 = vpop.f32.mrf.mxu0 }
  0xc9   : > { %v437_v50 = vadd.f32 %v1041_v38, %v436_v36 }
  0xcb   : > { %v510_v58 = vmax.f32 %v437_v50, 0.0 }
  0xcd   : > { %v541_v63 = vadd.f32 %v540_v60, %v510_v58 }
  0xce   : > { %v1036_v37 = vpop.f32.mrf.mxu2 }
  0xcf   : > { %v1051_v56 = vpop.f32.mrf.mxu3  ;;  %v467_v43 = vadd.f32 %v1041_v38, %v1036_v37 }
  0xd0   : > { %v438_v40 = vpop.f32.mrf.mxu0  ;;  %v492_v14 = vadd.f32 %v1041_v38, %v1051_v56 }
  0xd1   : > { %v439_v54 = vadd.f32 %v1041_v38, %v438_v40  ;;  %v464_v40 = vadd.f32 %v1041_v38, %v1032_v34  ;;  %v522_v49 = vmax.f32 %v467_v43, 0.0 }
  0xd3   : > { %v511_v61 = vmax.f32 %v439_v54, 0.0  ;;  %v521_v45 = vmax.f32 %v464_v40, 0.0 }
  0xd5   : > { %v542_v3 = vadd.f32 %v541_v63, %v511_v61  ;;  %v886_v63 = vld [vmem:[%s1126_s3 + $0x8] sm:$0xff] }
  0xd6   : > { %v468_v47 = vpop.f32.mrf.mxu2 }
  0xd7   : > { %v1057_v9 = vpop.f32.mrf.mxu3  ;;  %v469_v46 = vadd.f32 %v1041_v38, %v468_v47 }
  0xd8   : > { %v441_v51 = vpop.f32.mrf.mxu0  ;;  %v494_v17 = vadd.f32 %v1041_v38, %v1057_v9 }
  0xd9   : > { %v442_v59 = vadd.f32 %v1041_v38, %v441_v51  ;;  %v888_v51 = vld [vmem:[%s1126_s3 + $0x18] sm:$0xff]  ;;  %v523_v52 = vmax.f32 %v469_v46, 0.0 }
  0xda   : > { %646 = vmatpush.bf16.msrb.mxu1 %v888_v51  ;;  %v533_v21 = vmax.f32 %v494_v17, 0.0 }
  0xdb   : > { %v512_v0 = vmax.f32 %v442_v59, 0.0  ;;  %v887_v59 = vld [vmem:[%s1126_s3 + $0x10] sm:$0xff] }
  0xdd   : > { %v543_v6 = vadd.f32 %v542_v3, %v512_v0  ;;  %v482_v0 = vadd.f32 %v1041_v38, %v1028_v27  ;;  %v484_v3 = vadd.f32 %v1041_v38, %v1030_v30  ;;  %v489_v27 = vadd.f32 %v1041_v38, %v1043_v41 }
  0xde   : > { %v471_v62 = vpop.f32.mrf.mxu2  ;;  %647 = vmatpush.bf16.msrb.mxu1 %v887_v59  ;;  %v530_v30 = vmax.f32 %v487_v8, 0.0 }
  0xdf   : > { %v496_v36 = vpop.f32.mrf.mxu3  ;;  %v472_v50 = vadd.f32 %v1041_v38, %v471_v62 }
  0xe0   : > { %v443_v1 = vpop.f32.mrf.mxu0  ;;  %v497_v35 = vadd.f32 %v1041_v38, %v496_v36 }
  0xe1   : > { %v444_v4 = vadd.f32 %v1041_v38, %v443_v1  ;;  %v524_v57 = vmax.f32 %v472_v50, 0.0 }
  0xe2   : > { %648 = vmatpush.bf16.msrb.mxu1 %v886_v63 }
  0xe3   : > { %v513_v7 = vmax.f32 %v444_v4, 0.0 }
  0xe5   : > { %v544_v12 = vadd.f32 %v543_v6, %v513_v7  ;;  %v885_v6 = vld [vmem:[%s1126_s3] sm:$0xff]  ;;  %v528_v7 = vmax.f32 %v482_v0, 0.0 }
  0xe6   : > { %v473_v13 = vpop.f32.mrf.mxu2  ;;  %649 = vmatpush.bf16.msrb.mxu1 %v885_v6 }
  0xe7   : > { %v545_v16 = vadd.f32 %v544_v12, %v514_v10  ;;  %v474_v37 = vadd.f32 %v1041_v38, %v473_v13  ;;  %v498_v55 = vpop.f32.mrf.mxu3  ;;  %v529_v12 = vmax.f32 %v484_v3, 0.0 }
  0xe8   : > { %v499_v22 = vadd.f32 %v1041_v38, %v498_v55 }
  0xe9   : > { %v546_v20 = vadd.f32 %v545_v16, %v515_v15  ;;  %v525_v60 = vmax.f32 %v474_v37, 0.0  ;;  %v531_v16 = vmax.f32 %v489_v27, 0.0 }
  0xea   : > { %v535_v56 = vmax.f32 %v499_v22, 0.0 }
  0xeb   : > { %v547_v24 = vadd.f32 %v546_v20, %v516_v19  ;;  %v532_v19 = vmax.f32 %v492_v14, 0.0 }
  0xed   : > { %v548_v32 = vadd.f32 %v547_v24, %v517_v23  ;;  %v534_v24 = vmax.f32 %v497_v35, 0.0 }
  0xee   : > { %v476_v33 = vpop.f32.mrf.mxu2 }
  0xef   : > { %v549_v42 = vadd.f32 %v548_v32, %v518_v26  ;;  %v477_v47 = vadd.f32 %v1041_v38, %v476_v33  ;;  %v501_v11 = vpop.f32.mrf.mxu3 }
  0xf0   : > { %v502_v29 = vadd.f32 %v1041_v38, %v501_v11 }
  0xf1   : > { %v550_v44 = vadd.f32 %v549_v42, %v519_v39  ;;  %v526_v2 = vmax.f32 %v477_v47, 0.0 }
  0xf2   : > { %v536_v9 = vmax.f32 %v502_v29, 0.0 }
  0xf3   : > { %v551_v48 = vadd.f32 %v550_v44, %v520_v28 }
  0xf5   : > { %v552_v34 = vadd.f32 %v551_v48, %v521_v45 }
  0xf6   : > { %v478_v54 = vpop.f32.mrf.mxu2 }
  0xf7   : > { %v553_v53 = vadd.f32 %v552_v34, %v522_v49  ;;  %v479_v62 = vadd.f32 %v1041_v38, %v478_v54  ;;  %v503_v23 = vpop.f32.mrf.mxu3  ;;  %v593_v49 = vld [vmem:[%s1127_s4] sm:$0x1] }
  0xf8   : > { %v504_v33 = vadd.f32 %v1041_v38, %v503_v23 }
  0xf9   : > { %v554_v58 = vadd.f32 %v553_v53, %v523_v52  ;;  %v527_v5 = vmax.f32 %v479_v62, 0.0 }
  0xfa   : > { %v537_v40 = vmax.f32 %v504_v33, 0.0 }
  0xfb   : > { %v555_v61 = vadd.f32 %v554_v58, %v524_v57 }
  0xfd   : > { %v556_v1 = vadd.f32 %v555_v61, %v525_v60 }
  0xff   : > { %v557_v4 = vadd.f32 %v556_v1, %v526_v2 }
 0x101   : > { %v558_v10 = vadd.f32 %v557_v4, %v527_v5 }
 0x103   : > { %v559_v13 = vadd.f32 %v558_v10, %v528_v7 }
 0x105   : > { %v560_v15 = vadd.f32 %v559_v13, %v529_v12 }
 0x107   : > { %v561_v18 = vadd.f32 %v560_v15, %v530_v30 }
 0x109   : > { %v562_v20 = vadd.f32 %v561_v18, %v531_v16 }
 0x10b   : > { %v563_v41 = vadd.f32 %v562_v20, %v532_v19 }
 0x10d   : > { %v564_v26 = vadd.f32 %v563_v41, %v533_v21 }
 0x10f   : > { %v565_v32 = vadd.f32 %v564_v26, %v534_v24 }
 0x111   : > { %v566_v25 = vadd.f32 %v565_v32, %v535_v56 }
 0x113   : > { %v567_v39 = vadd.f32 %v566_v25, %v536_v9 }
 0x115   : > { %v568_v42 = vadd.f32 %v567_v39, %v537_v40 }
 0x117   : > { %v569_v36 = vrot.slane %v568_v42, 4 }
 0x119   : > { %v570_v28 = vadd.f32 %v569_v36, %v568_v42 }
 0x11b   : > { %v571_v43 = vrot.slane %v570_v28, 2 }
 0x11d   : > { %v572_v44 = vadd.f32 %v571_v43, %v570_v28 }
 0x11f   : > { %v573_v31 = vrot.slane %v572_v44, 1 }
 0x121   : > { %v574_v45 = vadd.f32 %v573_v31, %v572_v44 }
 0x123   : > { %v575_v46 = vmul.f32 0.00390625, %v574_v45 }
 0x125   : > { %v576_v48 = vpack.c.bf16 %v575_v46, %v575_v46 }
 0x127   : > { %650 = vmatmul.bf16.vlgmr.msrb.gmra.mxu1 %v576_v48 }
 0x1a4   : > { %v651_v50 = vpop.f32.mrf.mxu1 }
 0x1a5   : > { %v652_v38 = vadd.f32 %v651_v50, %v593_v49 }
 0x1a7   : > { %v857_v34 = vmul.f32 -1.442695, %v652_v38 }
 0x1a9   : > { %926 = vpow2.f32 %v857_v34 }
 0x1ac   : > { %v653_v51 = vpop.f32.mrf.mxu1 }
 0x1af   : > { %v927_v52 = vpop.eup %926 }
 0x1b0   : > { %v658_v37 = vadd.f32 1.0, %v927_v52 }
 0x1b2   : > { %928 = vrcp.f32 %v658_v37  ;;  %v670_v57 = vand.u32 2147483648, %v658_v37  ;;  %v668_v47 = vand.u32 2147483647, %v658_v37  ;;  %vm664_vm1 = vweird.f32 %v658_v37 }
 0x1b4   : > { %v671_v60 = vor.u32 1.1754944e-38, %v670_v57  ;;  %vm669_vm3 = vcmp.eq.f32.partialorder %v668_v47, 8.507059e+37 }
 0x1b8   : > { %v929_v53 = vpop.eup %928 }
 0x1b9   : > { %v660_v54 = vmul.f32 %v929_v53, %v658_v37  ;;  %vm665_vm0 = vweird.f32 %v929_v53 }
 0x1ba   : > { %vm666_vm2 = vmor %vm664_vm1, %vm665_vm0 }
 0x1bb   : > { %v661_v55 = vsub.f32 1.0, %v660_v54 }
 0x1bd   : > { %v662_v58 = vmul.f32 %v929_v53, %v661_v55 }
 0x1bf   : > { %v663_v59 = vadd.f32 %v929_v53, %v662_v58 }
 0x1c1   : > { %v667_v61 = vsel %vm666_vm2, %v929_v53, %v663_v59 }
 0x1c2   : > { %v672_v62 = vsel %vm669_vm3, %v671_v60, %v667_v61 }
 0x1c3   : > { %674 = vst [vmem:[%s220_s14] sm:$0x1] %v672_v62 }
 0x1c4 PF: > { %s15_s18 = sadd.s32 1, %s936_s18  }
 0x1c5   : > { %p12_p4 = scmp.ge.s32.totalorder %s15_s18, 4  }
 0x1c7   :  { %14 = sbr.rel (!%p12_p4) target bundleno = 1 (0x1), region = 70 }

</bundles_post_ra>
